<compile_context>
chip_gen: v5e
topology: v5e:2x2
jax: 0.10.0
libtpu: 0.0.40
codegen_flags: <defaults>
</compile_context>

<pallas_src>
import jax
import jax.numpy as jnp
from jax.experimental import pallas as pl
from jax.experimental.pallas import tpu as pltpu

HIDDEN = 128          # stand-in for roberta-large hidden_size (lane-aligned)
S_DIM = 32
HC_DIM = 32
MLP_HID = (S_DIM + HC_DIM) // 2   # 32
N_CLASSES = 2
PAD_N = 128           # lane-dense padded output width (matches 128x128 MXU)
TB_MAX = 1024         # batch rows per grid step (VMEM use stays ~ a few MiB)


def _round_up(x, m):
    return ((x + m - 1) // m) * m


def _pair_head_kernel(text_ref, hc_ref,
                      wa_ref, wb_ref, b1_ref,
                      w2_ref, b2_ref,
                      prob_ref):
    # In-kernel bf16 cast of the f32 activation tiles (free VPU op; avoids a
    # separate wrapper-side astype that would double activation HBM traffic).
    text = text_ref[...].astype(jnp.bfloat16)
    hc = hc_ref[...].astype(jnp.bfloat16)

    # First (fused) MLP layer: h = relu(text @ W_a + hc @ W_b + b_fused)
    # W_a folds fc1 -> mlp[0] (s-half); W_b folds fc2 -> mlp[0] (hc-half).
    h = jnp.dot(text, wa_ref[...], preferred_element_type=jnp.float32)
    h = h + jnp.dot(hc, wb_ref[...], preferred_element_type=jnp.float32)
    h = h + b1_ref[...]                      # f32 bias, broadcast (1,32)->(TB,32)
    h = jnp.maximum(h, 0.0)                  # ReLU (f32 on the VPU)

    # Second MLP layer, padded to 128 output lanes. Pad columns have zero
    # weights and a -1e9 bias, so the full-row softmax below ignores them.
    logits = jnp.dot(h.astype(w2_ref.dtype), w2_ref[...],
                     preferred_element_type=jnp.float32) + b2_ref[...]

    # Max-stabilized softmax in f32 (v5e VPU/EUP have no bf16 datapath);
    # exact reciprocal — the kernel is HBM-bound so the divide is free.
    m = jnp.max(logits, axis=-1, keepdims=True)
    e = jnp.exp(logits - m)                  # exp(-1e9 - m) == 0 in pad lanes
    prob = e * pl.reciprocal(jnp.sum(e, axis=-1, keepdims=True))

    # Cast only at the final store: bf16 output halves the writeback bytes
    # while keeping the lane-dense 128-wide unmasked vst.
    prob_ref[...] = prob.astype(prob_ref.dtype)


def new_pair_model_forward(text_pooled, handcrafted, fused, *, tb=TB_MAX):
    """prob = softmax(mlp(cat(fc1(text_pooled), fc2(handcrafted))), -1)."""
    B = text_pooled.shape[0]

    # Pad batch only to a sublane multiple of 8 (no tile-granularity padding).
    B_pad = _round_up(B, 8)
    if B_pad != B:
        text_pooled = jnp.pad(text_pooled, ((0, B_pad - B), (0, 0)))
        handcrafted = jnp.pad(handcrafted, ((0, B_pad - B), (0, 0)))

    # Batch tile: multiple of 8, capped by tb, and aiming for >= 2 grid steps
    # so "parallel" dimension semantics can shard across both v7x TensorCores.
    TB = max(8, min(tb, _round_up(pl.cdiv(B_pad, 2), 8)))
    grid = (pl.cdiv(B_pad, TB),)             # ragged last tile allowed

    out = pl.pallas_call(
        _pair_head_kernel,
        out_shape=jax.ShapeDtypeStruct((B_pad, PAD_N), jnp.bfloat16),
        grid=grid,
        in_specs=[
            pl.BlockSpec((TB, HIDDEN), lambda i: (i, 0)),        # text tile (f32)
            pl.BlockSpec((TB, HC_DIM), lambda i: (i, 0)),        # handcrafted (f32)
            pl.BlockSpec((HIDDEN, MLP_HID), lambda i: (0, 0)),   # W_a (resident, bf16)
            pl.BlockSpec((HC_DIM, MLP_HID), lambda i: (0, 0)),   # W_b (resident, bf16)
            pl.BlockSpec((1, MLP_HID), lambda i: (0, 0)),        # fused bias (f32)
            pl.BlockSpec((MLP_HID, PAD_N), lambda i: (0, 0)),    # W2 padded (bf16)
            pl.BlockSpec((1, PAD_N), lambda i: (0, 0)),          # b2 padded (f32)
        ],
        out_specs=pl.BlockSpec((TB, PAD_N), lambda i: (i, 0)),
        compiler_params=pltpu.CompilerParams(
            dimension_semantics=("parallel",)),   # dual-TC on v7x, pipelined DMA
    )(text_pooled, handcrafted,
      fused["wa"], fused["wb"], fused["b1"], fused["w2"], fused["b2"])

    # Slice off pad rows / pad lanes; the downstream-facing dtype is f32.
    return out[:B, :N_CLASSES].astype(jnp.float32)


def init_params(key):
    """Deterministic synthetic parameters (PyTorch nn.Linear-style shapes)."""
    ks = jax.random.split(key, 8)

    def uni(k, shape, fan_in):
        bound = 1.0 / jnp.sqrt(jnp.float32(fan_in))
        return jax.random.uniform(k, shape, jnp.float32, -bound, bound)

    return {
        "fc1_w": uni(ks[0], (HIDDEN, S_DIM), HIDDEN),          # (in, out)
        "fc1_b": uni(ks[1], (1, S_DIM), HIDDEN),
        "fc2_w": uni(ks[2], (HC_DIM, HC_DIM), HC_DIM),
        "fc2_b": uni(ks[3], (1, HC_DIM), HC_DIM),
        "mlp_w1": uni(ks[4], (S_DIM + HC_DIM, MLP_HID), S_DIM + HC_DIM),
        "mlp_b1": uni(ks[5], (1, MLP_HID), S_DIM + HC_DIM),
        "mlp_w2": uni(ks[6], (MLP_HID, N_CLASSES), MLP_HID),
        "mlp_b2": uni(ks[7], (1, N_CLASSES), MLP_HID),
    }


def prepare_fused_params(params):
    """Fold fc1/fc2 into the first MLP layer and pad the last layer to 128 lanes.

    Exact algebra (ReLU is the first nonlinearity):
      mlp_in = cat(text@fc1_w + fc1_b, hc@fc2_w + fc2_b)
      h_pre  = mlp_in @ W1 + b1
             = text @ (fc1_w@W1_s) + hc @ (fc2_w@W1_h)
               + (fc1_b@W1_s + fc2_b@W1_h + b1)
    """
    w1_s = params["mlp_w1"][:S_DIM, :]
    w1_h = params["mlp_w1"][S_DIM:, :]
    wa = params["fc1_w"] @ w1_s                                   # (HIDDEN, 32)
    wb = params["fc2_w"] @ w1_h                                   # (32, 32)
    b1 = params["fc1_b"] @ w1_s + params["fc2_b"] @ w1_h + params["mlp_b1"]

    # Lane-dense final layer: zero weights and -1e9 bias in pad columns so a
    # full-width softmax reproduces the 2-class softmax exactly.
    w2_pad = jnp.zeros((MLP_HID, PAD_N), jnp.float32)
    w2_pad = w2_pad.at[:, :N_CLASSES].set(params["mlp_w2"])
    b2_pad = jnp.full((1, PAD_N), -1e9, jnp.float32)
    b2_pad = b2_pad.at[:, :N_CLASSES].set(params["mlp_b2"])

    # TODO(synk): on v7x the text/W_a matmul could use fp8 (e4m3) for another
    # ~15% HBM-byte cut; not done here since v5e/v6e MXUs are int8/int4 only.
    return {
        "wa": wa.astype(jnp.bfloat16),
        "wb": wb.astype(jnp.bfloat16),
        "b1": b1.astype(jnp.float32),
        "w2": w2_pad.astype(jnp.bfloat16),
        "b2": b2_pad.astype(jnp.float32),
    }


def reference_forward(text_pooled, handcrafted, params):
    """Pure-JAX f32 reference of the original (unfused) module math."""
    s = text_pooled @ params["fc1_w"] + params["fc1_b"]
    hc = handcrafted @ params["fc2_w"] + params["fc2_b"]
    cat = jnp.concatenate([s, hc], axis=-1)
    h = jnp.maximum(cat @ params["mlp_w1"] + params["mlp_b1"], 0.0)
    logits = h @ params["mlp_w2"] + params["mlp_b2"]
    return jax.nn.softmax(logits, axis=-1)


if __name__ == "__main__":
    key = jax.random.PRNGKey(0)
    k_p, k_t, k_h = jax.random.split(key, 3)

    B = 8
    # TODO(synk): the RoBERTa-large text encoder is not translated; its pooled
    # output is modeled as a synthetic (B, HIDDEN) input tensor.
    text_pooled = jax.random.normal(k_t, (B, HIDDEN), jnp.float32)
    handcrafted = jax.random.normal(k_h, (B, HC_DIM), jnp.float32)

    params = init_params(k_p)
    fused = prepare_fused_params(params)

    prob = new_pair_model_forward(text_pooled, handcrafted, fused)
    prob = jax.block_until_ready(prob)

    ref = reference_forward(text_pooled, handcrafted, params)
    assert prob.shape == (B, N_CLASSES)
    # bf16 matmuls + bf16 output store -> relaxed tolerances vs. f32 reference.
    assert jnp.allclose(jnp.sum(prob, axis=-1), 1.0, atol=1e-2)
    assert jnp.allclose(prob, ref, atol=3e-2, rtol=3e-2)

    print("KERNEL_OK")
</pallas_src>

<mosaic_0001>
module attributes {stable_mosaic.version = 11 : i64} {
  func.func @_pair_head_kernel(%arg0: i32, %arg1: memref<8x128xf32, #tpu.memory_space<vmem>>, %arg2: memref<8x32xf32, #tpu.memory_space<vmem>>, %arg3: memref<128x32xbf16, #tpu.memory_space<vmem>>, %arg4: memref<32x32xbf16, #tpu.memory_space<vmem>>, %arg5: memref<1x32xf32, #tpu.memory_space<vmem>>, %arg6: memref<32x128xbf16, #tpu.memory_space<vmem>>, %arg7: memref<1x128xf32, #tpu.memory_space<vmem>>, %arg8: memref<8x128xbf16, #tpu.memory_space<vmem>>) attributes {dimension_semantics = [#tpu.dimension_semantics<parallel>], iteration_bounds = array<i64: 1>, scalar_prefetch = 0 : i64, scratch_operands = 0 : i64, tpu.core_type = #tpu.core_type<tc>, window_params = [{transform_indices = @transform_0, window_bounds = array<i64: 8, 128>}, {transform_indices = @transform_1, window_bounds = array<i64: 8, 32>}, {pipeline_mode = #tpu.pipeline_mode<synchronous>, transform_indices = @transform_2, window_bounds = array<i64: 128, 32>}, {pipeline_mode = #tpu.pipeline_mode<synchronous>, transform_indices = @transform_3, window_bounds = array<i64: 32, 32>}, {pipeline_mode = #tpu.pipeline_mode<synchronous>, transform_indices = @transform_4, window_bounds = array<i64: 1, 32>}, {pipeline_mode = #tpu.pipeline_mode<synchronous>, transform_indices = @transform_5, window_bounds = array<i64: 32, 128>}, {pipeline_mode = #tpu.pipeline_mode<synchronous>, transform_indices = @transform_6, window_bounds = array<i64: 1, 128>}, {transform_indices = @transform_7, window_bounds = array<i64: 8, 128>}]} {
    %c0 = arith.constant 0 : index
    %c0_0 = arith.constant 0 : index
    %0 = vector.load %arg1[%c0, %c0_0] : memref<8x128xf32, #tpu.memory_space<vmem>>, vector<8x128xf32>
    %1 = arith.truncf %0 : vector<8x128xf32> to vector<8x128xbf16>
    %c0_1 = arith.constant 0 : index
    %c0_2 = arith.constant 0 : index
    %2 = vector.load %arg2[%c0_1, %c0_2] : memref<8x32xf32, #tpu.memory_space<vmem>>, vector<8x32xf32>
    %3 = arith.truncf %2 : vector<8x32xf32> to vector<8x32xbf16>
    %c0_3 = arith.constant 0 : index
    %c0_4 = arith.constant 0 : index
    %4 = vector.load %arg3[%c0_3, %c0_4] : memref<128x32xbf16, #tpu.memory_space<vmem>>, vector<128x32xbf16>
    %cst = arith.constant dense<0.000000e+00> : vector<8x32xf32>
    %5 = tpu.matmul %1, %4, %cst {dimension_numbers = #tpu.dot_dimension_numbers<[1], [0], [0], [1], [0, 0, 1, 1], [], []>} : vector<8x128xbf16>, vector<128x32xbf16>, vector<8x32xf32> -> vector<8x32xf32>
    %c0_5 = arith.constant 0 : index
    %c0_6 = arith.constant 0 : index
    %6 = vector.load %arg4[%c0_5, %c0_6] : memref<32x32xbf16, #tpu.memory_space<vmem>>, vector<32x32xbf16>
    %cst_7 = arith.constant dense<0.000000e+00> : vector<8x32xf32>
    %7 = tpu.matmul %3, %6, %cst_7 {dimension_numbers = #tpu.dot_dimension_numbers<[1], [0], [0], [1], [0, 0, 1, 1], [], []>} : vector<8x32xbf16>, vector<32x32xbf16>, vector<8x32xf32> -> vector<8x32xf32>
    %8 = arith.addf %5, %7 : vector<8x32xf32>
    %c0_8 = arith.constant 0 : index
    %c0_9 = arith.constant 0 : index
    %9 = vector.load %arg5[%c0_8, %c0_9] : memref<1x32xf32, #tpu.memory_space<vmem>>, vector<1x32xf32>
    %10 = vector.broadcast %9 : vector<1x32xf32> to vector<8x32xf32>
    %11 = arith.addf %8, %10 : vector<8x32xf32>
    %cst_10 = arith.constant 0.000000e+00 : f32
    %12 = vector.broadcast %cst_10 : f32 to vector<8x32xf32>
    %13 = arith.maximumf %11, %12 : vector<8x32xf32>
    %14 = arith.truncf %13 : vector<8x32xf32> to vector<8x32xbf16>
    %c0_11 = arith.constant 0 : index
    %c0_12 = arith.constant 0 : index
    %15 = vector.load %arg6[%c0_11, %c0_12] : memref<32x128xbf16, #tpu.memory_space<vmem>>, vector<32x128xbf16>
    %cst_13 = arith.constant dense<0.000000e+00> : vector<8x128xf32>
    %16 = tpu.matmul %14, %15, %cst_13 {dimension_numbers = #tpu.dot_dimension_numbers<[1], [0], [0], [1], [0, 0, 1, 1], [], []>} : vector<8x32xbf16>, vector<32x128xbf16>, vector<8x128xf32> -> vector<8x128xf32>
    %c0_14 = arith.constant 0 : index
    %c0_15 = arith.constant 0 : index
    %17 = vector.load %arg7[%c0_14, %c0_15] : memref<1x128xf32, #tpu.memory_space<vmem>>, vector<1x128xf32>
    %18 = vector.broadcast %17 : vector<1x128xf32> to vector<8x128xf32>
    %19 = arith.addf %16, %18 : vector<8x128xf32>
    %cst_16 = arith.constant dense<0xFF800000> : vector<8xf32>
    %20 = vector.multi_reduction <maximumf>, %19, %cst_16 [1] : vector<8x128xf32> to vector<8xf32>
    %21 = vector.shape_cast %20 : vector<8xf32> to vector<8x1xf32>
    %22 = vector.broadcast %21 : vector<8x1xf32> to vector<8x128xf32>
    %23 = arith.subf %19, %22 : vector<8x128xf32>
    %24 = math.exp %23 : vector<8x128xf32>
    %cst_17 = arith.constant dense<0.000000e+00> : vector<8xf32>
    %25 = vector.multi_reduction <add>, %24, %cst_17 [1] : vector<8x128xf32> to vector<8xf32>
    %26 = vector.shape_cast %25 : vector<8xf32> to vector<8x1xf32>
    %27 = tpu.reciprocal %26 : vector<8x1xf32> -> vector<8x1xf32>
    %28 = vector.broadcast %27 : vector<8x1xf32> to vector<8x128xf32>
    %29 = arith.mulf %24, %28 : vector<8x128xf32>
    %30 = arith.truncf %29 : vector<8x128xf32> to vector<8x128xbf16>
    %c0_18 = arith.constant 0 : index
    %c0_19 = arith.constant 0 : index
    %31 = vector.load %arg8[%c0_18, %c0_19] : memref<8x128xbf16, #tpu.memory_space<vmem>>, vector<8x128xbf16>
    tpu.vector_store %arg8[%c0_18, %c0_19], %30 {strides = array<i32>} : memref<8x128xbf16, #tpu.memory_space<vmem>>, vector<8x128xbf16>,
    return
  }
  func.func @transform_0(%arg0: i32) -> (i32, i32) {
    %c0_i32 = arith.constant 0 : i32
    %c0_i32_0 = arith.constant 0 : i32
    return %arg0, %c0_i32 : i32, i32
  }
  func.func @transform_1(%arg0: i32) -> (i32, i32) {
    %c0_i32 = arith.constant 0 : i32
    %c0_i32_0 = arith.constant 0 : i32
    return %arg0, %c0_i32 : i32, i32
  }
  func.func @transform_2(%arg0: i32) -> (i32, i32) {
    %c0_i32 = arith.constant 0 : i32
    %c0_i32_0 = arith.constant 0 : i32
    %c0_i32_1 = arith.constant 0 : i32
    return %c0_i32, %c0_i32_0 : i32, i32
  }
  func.func @transform_3(%arg0: i32) -> (i32, i32) {
    %c0_i32 = arith.constant 0 : i32
    %c0_i32_0 = arith.constant 0 : i32
    %c0_i32_1 = arith.constant 0 : i32
    return %c0_i32, %c0_i32_0 : i32, i32
  }
  func.func @transform_4(%arg0: i32) -> (i32, i32) {
    %c0_i32 = arith.constant 0 : i32
    %c0_i32_0 = arith.constant 0 : i32
    %c0_i32_1 = arith.constant 0 : i32
    return %c0_i32, %c0_i32_0 : i32, i32
  }
  func.func @transform_5(%arg0: i32) -> (i32, i32) {
    %c0_i32 = arith.constant 0 : i32
    %c0_i32_0 = arith.constant 0 : i32
    %c0_i32_1 = arith.constant 0 : i32
    return %c0_i32, %c0_i32_0 : i32, i32
  }
  func.func @transform_6(%arg0: i32) -> (i32, i32) {
    %c0_i32 = arith.constant 0 : i32
    %c0_i32_0 = arith.constant 0 : i32
    %c0_i32_1 = arith.constant 0 : i32
    return %c0_i32, %c0_i32_0 : i32, i32
  }
  func.func @transform_7(%arg0: i32) -> (i32, i32) {
    %c0_i32 = arith.constant 0 : i32
    %c0_i32_0 = arith.constant 0 : i32
    return %arg0, %c0_i32 : i32, i32
  }
}

</mosaic_0001>

<bundles_post_ra>
// kernel: tpu_custom_call.1
= control target key start
LH: loop header
LB: loop body
LE: loop exit
PB: predicated region body
PF: predicated region fallthrough
CT: control target
= control target key end

     0   :  { %s414_s0 = inlined_call_operand.vmem [shape: f32[8,128], index: 0, kind: input, shape index: {}]   ;;  %s415_s1 = inlined_call_operand.vmem [shape: f32[8,32], index: 1, kind: input, shape index: {}]   ;;  %s416_s2 = inlined_call_operand.vmem [shape: bf16[128,32], index: 2, kind: input, shape index: {}]   ;;  %s417_s3 = inlined_call_operand.vmem [shape: bf16[32,32], index: 3, kind: input, shape index: {}]   ;;  %s418_s4 = inlined_call_operand.vmem [shape: f32[1,32], index: 4, kind: input, shape index: {}]   ;;  %s419_s5 = inlined_call_operand.vmem [shape: bf16[32,128], index: 5, kind: input, shape index: {}]   ;;  %s420_s6 = inlined_call_operand.vmem [shape: f32[1,128], index: 6, kind: input, shape index: {}]   ;;  %s421_s7 = inlined_call_operand.hbm [shape: bf16[8,128], index: 7, kind: output, shape index: {}]  }
   0x1   :  { %v282_v0 = vld [vmem:[%s416_s2 + $0x38] sm:$0xff]  ;;  %v284_v1 = vld [vmem:[%s417_s3 + $0x8] sm:$0xff]  ;;  %v281_v2 = vld [vmem:[%s416_s2 + $0x30] sm:$0xff] }
   0x2   :  { %129 = vmatpush.bf16.msra.mxu1 %v282_v0  ;;  %74 = vmatpush.bf16.msra.mxu0 %v284_v1  ;;  %v283_v3 = vld [vmem:[%s417_s3] sm:$0xff] }
   0x3   :  { %v30_v4 = vld [vmem:[%s415_s1] sm:$0xff] }
   0x4   :  { %12 = vsyncpa [#allocation3], 0  ;;  %v280_v5 = vld [vmem:[%s416_s2 + $0x28] sm:$0xff]  ;;  %v31_v6 = vpack.c.bf16 %v30_v4, %v30_v4  ;;  %vm64_vm0 = vcmask 261120   ;;  %v279_v7 = vld [vmem:[%s416_s2 + $0x20] sm:$0xff]  ;;  %s216_s30 = sshll.u32 %s421_s7, 4  ;;  %s217_s30 = int_to_ptr.hbm [resolvable:$true] %s216_s30 }
   0x5   :  { %v278_v8 = vld [vmem:[%s416_s2 + $0x18] sm:$0xff]  ;;  %v277_v9 = vld [vmem:[%s416_s2 + $0x10] sm:$0xff]  ;;  %v276_v10 = vld [vmem:[%s416_s2 + $0x8] sm:$0xff] }
   0x6   :  { %130 = vmatpush.bf16.msra.mxu1 %v281_v2  ;;  %75 = vmatpush.bf16.msra.mxu0 %v283_v3  ;;  %v275_v11 = vld [vmem:[%s416_s2] sm:$0xff]  ;;  %v286_v14 = vld [vmem:[%s419_s5 + $0x8] sm:$0xff] }
   0x7   :  { %v28_v12 = vld [vmem:[%s414_s0] sm:$0xff]  ;;  %178 = vmatpush.bf16.msra.mxu2 %v286_v14 }
   0x8   :  { %v29_v13 = vpack.c.bf16 %v28_v12, %v28_v12  ;;  %v285_v15 = vld [vmem:[%s419_s5] sm:$0xff] }
   0x9   :  { %233 = vmatmul.msk.bf16.vlgmr.msra.gmra.mxu0 %vm64_vm0, %v31_v6  ;;  %v288_v18 = vld [vmem:[%s418_s4] ss:$0 sm:$0xff]  ;;  %s320_s4 = smov [#allocation2]  }
   0xa   :  { %131 = vmatpush.bf16.msra.mxu1 %v280_v5  ;;  %v289_v25 = vld [vmem:[%s420_s6] ss:$0 sm:$0xff]  ;;  %s214_s5 = sshll.u32 %s320_s4, 4  ;;  %s215_s5 = int_to_ptr.vmem [resolvable:$true] %s214_s5 }
   0xb   :  { %179 = vmatpush.bf16.msra.mxu2 %v285_v15 }
   0xe   :  { %132 = vmatpush.bf16.msra.mxu1 %v279_v7 }
  0x12   :  { %133 = vmatpush.bf16.msra.mxu1 %v278_v8 }
  0x16   :  { %134 = vmatpush.bf16.msra.mxu1 %v277_v9 }
  0x1a   :  { %135 = vmatpush.bf16.msra.mxu1 %v276_v10 }
  0x1e   :  { %136 = vmatpush.bf16.msra.mxu1 %v275_v11 }
  0x21   :  { %137 = vmatmul.bf16.vlgmr.msra.gmra.mxu1 %v29_v13 }
  0x86   :  { %v77_v16 = vpop.f32.mrf.mxu0 }
  0x8e   :  { %v79_v17 = vpop.f32.mrf.mxu0 }
  0x9e   :  { %v138_v19 = vpop.f32.mrf.mxu1 }
  0x9f   :  { %v139_v20 = vadd.f32 %v138_v19, %v77_v16 }
  0xa1   :  { %v146_v21 = vadd.f32 %v288_v18, %v139_v20 }
  0xa3   :  { %v147_v22 = vmax.f32 %v146_v21, 0.0 }
  0xa5   :  { %v148_v23 = vpack.c.bf16 %v147_v22, %v147_v22 }
  0xa6   :  { %v140_v24 = vpop.f32.mrf.mxu1 }
  0xa7   :  { %274 = vmatmul.msk.bf16.vlgmr.msra.gmra.mxu2 %vm64_vm0, %v148_v23 }
 0x12a   :  { %v181_v26 = vpop.f32.mrf.mxu2 }
 0x12b   :  { %v182_v27 = vadd.f32 %v289_v25, %v181_v26 }
 0x12d   :  { %185 = vmax.xlane.f32.xlu0 %v182_v27 }
 0x132   :  { %v183_v28 = vpop.f32.mrf.mxu2 }
 0x1a0   :  { %v186_v29 = vpop.xlane.xlu0 %185 }
 0x1a1   :  { %v187_v30 = vsub.f32 %v182_v27, %v186_v29 }
 0x1a3   :  { %v188_v31 = vmul.f32 1.442695, %v187_v30 }
 0x1a5   :  { %290 = vpow2.f32 %v188_v31 }
 0x1ab   :  { %v291_v32 = vpop.eup %290 }
 0x1ac   :  { %190 = vadd.xlane.f32.xlu0 %v291_v32 }
 0x21f   :  { %v191_v33 = vpop.xlane.xlu0 %190 }
 0x220   :  { %292 = vrcp.f32 %v191_v33  ;;  %v203_v37 = vand.u32 2147483648, %v191_v33  ;;  %v201_v39 = vand.u32 2147483647, %v191_v33  ;;  %vm197_vm2 = vweird.f32 %v191_v33 }
 0x222   :  { %v204_v41 = vor.u32 1.1754944e-38, %v203_v37  ;;  %vm202_vm4 = vcmp.eq.f32.partialorder %v201_v39, 8.507059e+37 }
 0x226   :  { %v293_v34 = vpop.eup %292 }
 0x227   :  { %v193_v35 = vmul.f32 %v293_v34, %v191_v33  ;;  %vm198_vm1 = vweird.f32 %v293_v34 }
 0x228   :  { %vm199_vm3 = vmor %vm197_vm2, %vm198_vm1 }
 0x229   :  { %v194_v36 = vsub.f32 1.0, %v193_v35 }
 0x22b   :  { %v195_v38 = vmul.f32 %v293_v34, %v194_v36 }
 0x22d   :  { %v196_v40 = vadd.f32 %v293_v34, %v195_v38 }
 0x22f   :  { %v200_v42 = vsel %vm199_vm3, %v293_v34, %v196_v40 }
 0x230   :  { %v205_v43 = vsel %vm202_vm4, %v204_v41, %v200_v42 }
 0x231   :  { %v206_v44 = vmul.f32 %v291_v32, %v205_v43 }
 0x233   :  { %v207_v45 = vpack.c.bf16 %v206_v44, %v206_v44 }
 0x235   :  { %208 = vst [vmem:[#allocation2] sm:$0xf] %v207_v45 }
 0x236   :  { %219 = dma.vmem_to_hbm [thread:$0]  %s215_s5, 64, %s217_s30, [#allocation3]  }
 0x237   :  { %318 = dma.done.wait [#allocation3], 64  }
 0x238   :  { %319 = vsyncadd [#allocation3], 4294967232 }
 0x239   :  { %224 = vsyncpa [#allocation3], 1 }

</bundles_post_ra>
